<compile_context>
chip_gen: v6e
topology: v6e:2x2x1
jax: 0.10.0
libtpu: 0.0.40
codegen_flags: <defaults>
</compile_context>

<pallas_src>
import jax
import jax.numpy as jnp
import numpy as np
from jax.experimental import pallas as pl
from jax.experimental.pallas import tpu as pltpu


# ---------------- in-kernel conv helper ----------------

def _conv_tile(x_ref, w_ref, d_tile, H, WC2):
    """Conv for the d_tile output depth planes of the current (n, i) tile.

    x_ref: (1, D+2, H+2, WC2) padded input (full depth resident in VMEM).
    w_ref: (3, 3*WC2, W*Cout) block-diagonal weight (kh, kw folded into K).
    Returns the conv activation as f32 of shape (d_tile*H, W*Cout).
    """
    base_d = pl.program_id(1) * d_tile
    # One dynamic-start window load along the (leading) depth axis.
    xwin = x_ref[0, pl.ds(base_d, d_tile + 2), :, :]     # (d_tile+2, H+2, WC2)
    # Fold kh into the contraction dim: plane j -> (H, 3*WC2).
    rows = [jnp.concatenate([xwin[j, kh:kh + H, :] for kh in range(3)], axis=1)
            for j in range(d_tile + 2)]
    acc = None
    for kd in range(3):
        # Batch M over the d_tile output planes (contiguous input planes).
        lhs = jnp.concatenate(rows[kd:kd + d_tile], axis=0)   # (d_tile*H, 3*WC2)
        part = jnp.dot(lhs, w_ref[kd], preferred_element_type=jnp.float32)
        acc = part if acc is None else acc + part
    return acc                                                # (d_tile*H, W*Cout)


def _make_stats_kernel(d_tile, H, WC2):
    """Kernel 1: BN batch-statistic partials, accumulated over depth tiles."""
    def kernel(x_ref, w_ref, sum_ref, sq_ref):
        @pl.when(pl.program_id(1) == 0)
        def _():
            sum_ref[...] = jnp.zeros_like(sum_ref)
            sq_ref[...] = jnp.zeros_like(sq_ref)
        acc = _conv_tile(x_ref, w_ref, d_tile, H, WC2)
        sum_ref[0] += jnp.sum(acc, axis=0, keepdims=True)
        sq_ref[0] += jnp.sum(acc * acc, axis=0, keepdims=True)
    return kernel


def _make_apply_kernel(d_tile, H, WC2):
    """Kernel 2: conv (recomputed) + BN affine + ReLU, lane-dense store."""
    def kernel(x_ref, w_ref, scale_ref, shift_ref, y_ref):
        acc = _conv_tile(x_ref, w_ref, d_tile, H, WC2)
        y = jnp.maximum(acc * scale_ref[...] + shift_ref[...], 0.0)
        y_ref[0] = y.reshape(y_ref.shape[1:]).astype(y_ref.dtype)
    return kernel


# ---------------- wrapper ----------------

def ecre_forward(x, w, b, gamma, beta, up_scale=2, eps=1e-5,
                 d_tile=None, compute_dtype=jnp.float32):
    # Conv bias `b` is intentionally unused: with training-mode (batch stats)
    # BatchNorm the batch mean cancels it exactly.
    del b
    N, C, D, H, W = x.shape
    Cout = int(w.shape[0])
    r = up_scale
    assert D % (r * r) == 0, "PixelShuffle(r) on a 5-D NCDHW tensor needs D % r**2 == 0"
    if d_tile is None:
        d_tile = r * r
        # Prefer >= 2 depth tiles so both v7x TensorCores get work even at N == 1.
        while D // d_tile < 2 and d_tile % 2 == 0 and D % (d_tile // 2) == 0:
            d_tile //= 2
    assert D % d_tile == 0
    nd = D // d_tile

    WC2 = (W + 2) * C                       # padded-input lane width (W-major, C-minor)
    WCo = W * Cout                          # output lane width (lane dense when >= 128)

    # ---- input glue: NCDHW -> NDHWC -> zero-pad -> (N, D+2, H+2, (W+2)*C) ----
    # TODO(synk): fuse transpose+pad (or mask padding in-kernel) to drop one
    #             full-tensor HBM pass; matters most on v5e at production shapes.
    x_ndhwc = jnp.transpose(x, (0, 2, 3, 4, 1))
    xp = jnp.pad(x_ndhwc, ((0, 0), (1, 1), (1, 1), (1, 1), (0, 0)))
    xp = xp.reshape(N, D + 2, H + 2, WC2).astype(compute_dtype)

    # ---- weight glue (one einsum against a constant one-hot scatter):
    #      Wk[kd, kh*WC2 + (wp+kw)*C + c, wp*Cout + co] = w[co, c, kd, kh, kw]
    w_t = jnp.transpose(w, (2, 3, 4, 1, 0)).astype(jnp.float32)   # (kd,kh,kw,C,Cout)
    scat = np.zeros((3, W, W + 2), np.float32)
    for kw in range(3):
        scat[kw, np.arange(W), np.arange(W) + kw] = 1.0
    Wk = jnp.einsum('dhkcq,kpr->dhrcpq', w_t, scat).reshape(3, 3 * WC2, WCo)
    Wk = Wk.astype(compute_dtype)

    grid = (N, nd)
    x_spec = pl.BlockSpec((1, D + 2, H + 2, WC2), lambda n, i: (n, 0, 0, 0))
    w_spec = pl.BlockSpec((3, 3 * WC2, WCo), lambda n, i: (0, 0, 0))
    # TODO(synk): pl.Buffered(1) on x_spec/w_spec (constant index maps) would halve
    #             their VMEM; only matters at large W/D (v7x 64 MiB VMEM).

    # ---- kernel 1: BN batch-statistic partials (conv activation never hits HBM) ----
    sum_part, sq_part = pl.pallas_call(
        _make_stats_kernel(d_tile, H, WC2),
        out_shape=(jax.ShapeDtypeStruct((N, 1, WCo), jnp.float32),
                   jax.ShapeDtypeStruct((N, 1, WCo), jnp.float32)),
        grid_spec=pltpu.PrefetchScalarGridSpec(
            num_scalar_prefetch=0, grid=grid,
            in_specs=[x_spec, w_spec],
            out_specs=(pl.BlockSpec((1, 1, WCo), lambda n, i: (n, 0, 0)),
                       pl.BlockSpec((1, 1, WCo), lambda n, i: (n, 0, 0)))),
        compiler_params=pltpu.CompilerParams(
            dimension_semantics=("parallel", "arbitrary")),
    )(xp, Wk)

    # ---- BN batch statistics (tiny per-channel reduction) ----
    cnt = float(N * D * H * W)
    s_c = jnp.sum(sum_part, axis=(0, 1)).reshape(W, Cout).sum(axis=0)
    q_c = jnp.sum(sq_part, axis=(0, 1)).reshape(W, Cout).sum(axis=0)
    mean = s_c / cnt
    var = jnp.maximum(q_c / cnt - mean * mean, 0.0)
    inv = gamma.astype(jnp.float32) * jax.lax.rsqrt(var + eps)
    scale_row = jnp.tile(inv, W).reshape(1, WCo)
    shift_row = jnp.tile(beta.astype(jnp.float32) - mean * inv, W).reshape(1, WCo)

    # ---- kernel 2: conv + BN affine + ReLU, written lane-dense as (N, D, H, W*Cout) ----
    y = pl.pallas_call(
        _make_apply_kernel(d_tile, H, WC2),
        out_shape=jax.ShapeDtypeStruct((N, D, H, WCo), jnp.float32),
        grid_spec=pltpu.PrefetchScalarGridSpec(
            num_scalar_prefetch=0, grid=grid,
            in_specs=[x_spec, w_spec,
                      pl.BlockSpec((1, WCo), lambda n, i: (0, 0)),
                      pl.BlockSpec((1, WCo), lambda n, i: (0, 0))],
            out_specs=pl.BlockSpec((1, d_tile, H, WCo), lambda n, i: (n, i, 0, 0))),
        compiler_params=pltpu.CompilerParams(
            dimension_semantics=("parallel", "parallel")),
    )(xp, Wk, scale_row, shift_row)

    # ---- PixelShuffle(r), PyTorch 5-D semantics (shuffled "channel" dim is D):
    #      one XLA transpose straight from the (N, D, H, W, Cout) layout.
    Dp = D // (r * r)
    y7 = y.reshape(N, Dp, r, r, H, W, Cout)
    out = jnp.transpose(y7, (0, 6, 1, 4, 2, 5, 3))       # (N, Cout, Dp, H, r, W, r)
    return out.reshape(N, Cout, Dp, H * r, W * r)


# ---------------- pure-JAX reference ----------------

def ecre_reference(x, w, b, gamma, beta, up_scale=2, eps=1e-5):
    conv = jax.lax.conv_general_dilated(
        x, w, window_strides=(1, 1, 1), padding=((1, 1), (1, 1), (1, 1)),
        dimension_numbers=("NCDHW", "OIDHW", "NCDHW"),
        precision=jax.lax.Precision.HIGHEST)
    conv = conv + b.reshape(1, -1, 1, 1, 1)
    mean = jnp.mean(conv, axis=(0, 2, 3, 4), keepdims=True)
    var = jnp.mean(jnp.square(conv - mean), axis=(0, 2, 3, 4), keepdims=True)
    y = (conv - mean) / jnp.sqrt(var + eps)
    y = y * gamma.reshape(1, -1, 1, 1, 1) + beta.reshape(1, -1, 1, 1, 1)
    y = jnp.maximum(y, 0.0)
    N, Cout, D, H, W = y.shape
    r = up_scale
    Dp = D // (r * r)
    y = y.reshape(N, Cout, Dp, r, r, H, W)
    y = jnp.transpose(y, (0, 1, 2, 5, 3, 6, 4))
    return y.reshape(N, Cout, Dp, H * r, W * r)


if __name__ == "__main__":
    # Small shapes consistent with ECRE(in_c=4, up_scale=2) on a 5-D NCDHW input.
    N, C, D, H, W = 2, 4, 4, 8, 8          # D divisible by up_scale**2
    up_scale = 2
    Cout = C * up_scale * up_scale          # 16

    key = jax.random.PRNGKey(0)
    kx, kw_key, kb = jax.random.split(key, 3)
    x = jax.random.normal(kx, (N, C, D, H, W), dtype=jnp.float32)
    fan_in = C * 27
    w = jax.random.normal(kw_key, (Cout, C, 3, 3, 3), dtype=jnp.float32) / np.sqrt(fan_in)
    b = jax.random.normal(kb, (Cout,), dtype=jnp.float32) * 0.1
    gamma = jnp.ones((Cout,), dtype=jnp.float32)    # BatchNorm3d default init
    beta = jnp.zeros((Cout,), dtype=jnp.float32)

    fwd = jax.jit(lambda x_, w_, b_, g_, bt_: ecre_forward(x_, w_, b_, g_, bt_, up_scale=2))
    out = jax.block_until_ready(fwd(x, w, b, gamma, beta))
    ref = jax.block_until_ready(ecre_reference(x, w, b, gamma, beta, up_scale=up_scale))

    assert out.shape == (N, Cout, D // (up_scale ** 2), H * up_scale, W * up_scale), out.shape
    np.testing.assert_allclose(np.asarray(out), np.asarray(ref), atol=1e-2, rtol=1e-2)

    print("KERNEL_OK")
</pallas_src>

<mosaic_0001>
module attributes {stable_mosaic.version = 11 : i64} {
  func.func @kernel(%arg0: i32, %arg1: i32, %arg2: memref<1x6x10x40xf32, #tpu.memory_space<vmem>>, %arg3: memref<3x120x128xf32, #tpu.memory_space<vmem>>, %arg4: memref<1x1x128xf32, #tpu.memory_space<vmem>>, %arg5: memref<1x1x128xf32, #tpu.memory_space<vmem>>) attributes {dimension_semantics = [#tpu.dimension_semantics<parallel>, #tpu.dimension_semantics<arbitrary>], iteration_bounds = array<i64: 2, 2>, scalar_prefetch = 0 : i64, scratch_operands = 0 : i64, tpu.core_type = #tpu.core_type<tc>, window_params = [{transform_indices = @transform_0, window_bounds = array<i64: 1, 6, 10, 40>}, {pipeline_mode = #tpu.pipeline_mode<synchronous>, transform_indices = @transform_1, window_bounds = array<i64: 3, 120, 128>}, {transform_indices = @transform_2, window_bounds = array<i64: 1, 1, 128>}, {transform_indices = @transform_3, window_bounds = array<i64: 1, 1, 128>}]} {
    %c0_i32 = arith.constant 0 : i32
    %0 = arith.cmpi eq, %arg1, %c0_i32 : i32
    %1 = arith.extui %0 : i1 to i32
    %c0_i32_0 = arith.constant 0 : i32
    %2 = arith.cmpi ne, %1, %c0_i32_0 : i32
    scf.if %2 {
      %cst_26 = arith.constant 0.000000e+00 : f32
      %66 = vector.broadcast %cst_26 : f32 to vector<1x1x128xf32>
      %c0_27 = arith.constant 0 : index
      %c0_28 = arith.constant 0 : index
      %c0_29 = arith.constant 0 : index
      %67 = vector.load %arg4[%c0_27, %c0_28, %c0_29] : memref<1x1x128xf32, #tpu.memory_space<vmem>>, vector<1x1x128xf32>
      tpu.vector_store %arg4[%c0_27, %c0_28, %c0_29], %66 {strides = array<i32>} : memref<1x1x128xf32, #tpu.memory_space<vmem>>, vector<1x1x128xf32>,
      %cst_30 = arith.constant 0.000000e+00 : f32
      %68 = vector.broadcast %cst_30 : f32 to vector<1x1x128xf32>
      %c0_31 = arith.constant 0 : index
      %c0_32 = arith.constant 0 : index
      %c0_33 = arith.constant 0 : index
      %69 = vector.load %arg5[%c0_31, %c0_32, %c0_33] : memref<1x1x128xf32, #tpu.memory_space<vmem>>, vector<1x1x128xf32>
      tpu.vector_store %arg5[%c0_31, %c0_32, %c0_33], %68 {strides = array<i32>} : memref<1x1x128xf32, #tpu.memory_space<vmem>>, vector<1x1x128xf32>,
    } else {
    }
    %c2_i32 = arith.constant 2 : i32
    %3 = arith.muli %arg1, %c2_i32 : i32
    %c0 = arith.constant 0 : index
    %4 = arith.index_cast %3 : i32 to index
    %c0_1 = arith.constant 0 : index
    %c0_2 = arith.constant 0 : index
    %5 = vector.load %arg2[%c0, %4, %c0_1, %c0_2] : memref<1x6x10x40xf32, #tpu.memory_space<vmem>>, vector<1x4x10x40xf32>
    %6 = vector.shape_cast %5 : vector<1x4x10x40xf32> to vector<4x10x40xf32>
    %7 = vector.extract_strided_slice %6 {offsets = [0, 0, 0], sizes = [1, 8, 40], strides = [1, 1, 1]} : vector<4x10x40xf32> to vector<1x8x40xf32>
    %8 = vector.shape_cast %7 : vector<1x8x40xf32> to vector<8x40xf32>
    %9 = vector.extract_strided_slice %6 {offsets = [0, 1, 0], sizes = [1, 8, 40], strides = [1, 1, 1]} : vector<4x10x40xf32> to vector<1x8x40xf32>
    %10 = vector.shape_cast %9 : vector<1x8x40xf32> to vector<8x40xf32>
    %11 = vector.extract_strided_slice %6 {offsets = [0, 2, 0], sizes = [1, 8, 40], strides = [1, 1, 1]} : vector<4x10x40xf32> to vector<1x8x40xf32>
    %12 = vector.shape_cast %11 : vector<1x8x40xf32> to vector<8x40xf32>
    %13 = tpu.concatenate %8, %10, %12 in 1 : vector<8x40xf32>, vector<8x40xf32>, vector<8x40xf32> -> vector<8x120xf32>
    %14 = vector.extract_strided_slice %6 {offsets = [1, 0, 0], sizes = [1, 8, 40], strides = [1, 1, 1]} : vector<4x10x40xf32> to vector<1x8x40xf32>
    %15 = vector.shape_cast %14 : vector<1x8x40xf32> to vector<8x40xf32>
    %16 = vector.extract_strided_slice %6 {offsets = [1, 1, 0], sizes = [1, 8, 40], strides = [1, 1, 1]} : vector<4x10x40xf32> to vector<1x8x40xf32>
    %17 = vector.shape_cast %16 : vector<1x8x40xf32> to vector<8x40xf32>
    %18 = vector.extract_strided_slice %6 {offsets = [1, 2, 0], sizes = [1, 8, 40], strides = [1, 1, 1]} : vector<4x10x40xf32> to vector<1x8x40xf32>
    %19 = vector.shape_cast %18 : vector<1x8x40xf32> to vector<8x40xf32>
    %20 = tpu.concatenate %15, %17, %19 in 1 : vector<8x40xf32>, vector<8x40xf32>, vector<8x40xf32> -> vector<8x120xf32>
    %21 = vector.extract_strided_slice %6 {offsets = [2, 0, 0], sizes = [1, 8, 40], strides = [1, 1, 1]} : vector<4x10x40xf32> to vector<1x8x40xf32>
    %22 = vector.shape_cast %21 : vector<1x8x40xf32> to vector<8x40xf32>
    %23 = vector.extract_strided_slice %6 {offsets = [2, 1, 0], sizes = [1, 8, 40], strides = [1, 1, 1]} : vector<4x10x40xf32> to vector<1x8x40xf32>
    %24 = vector.shape_cast %23 : vector<1x8x40xf32> to vector<8x40xf32>
    %25 = vector.extract_strided_slice %6 {offsets = [2, 2, 0], sizes = [1, 8, 40], strides = [1, 1, 1]} : vector<4x10x40xf32> to vector<1x8x40xf32>
    %26 = vector.shape_cast %25 : vector<1x8x40xf32> to vector<8x40xf32>
    %27 = tpu.concatenate %22, %24, %26 in 1 : vector<8x40xf32>, vector<8x40xf32>, vector<8x40xf32> -> vector<8x120xf32>
    %28 = vector.extract_strided_slice %6 {offsets = [3, 0, 0], sizes = [1, 8, 40], strides = [1, 1, 1]} : vector<4x10x40xf32> to vector<1x8x40xf32>
    %29 = vector.shape_cast %28 : vector<1x8x40xf32> to vector<8x40xf32>
    %30 = vector.extract_strided_slice %6 {offsets = [3, 1, 0], sizes = [1, 8, 40], strides = [1, 1, 1]} : vector<4x10x40xf32> to vector<1x8x40xf32>
    %31 = vector.shape_cast %30 : vector<1x8x40xf32> to vector<8x40xf32>
    %32 = vector.extract_strided_slice %6 {offsets = [3, 2, 0], sizes = [1, 8, 40], strides = [1, 1, 1]} : vector<4x10x40xf32> to vector<1x8x40xf32>
    %33 = vector.shape_cast %32 : vector<1x8x40xf32> to vector<8x40xf32>
    %34 = tpu.concatenate %29, %31, %33 in 1 : vector<8x40xf32>, vector<8x40xf32>, vector<8x40xf32> -> vector<8x120xf32>
    %35 = tpu.concatenate %13, %20 in 0 : vector<8x120xf32>, vector<8x120xf32> -> vector<16x120xf32>
    %c0_3 = arith.constant 0 : index
    %c0_4 = arith.constant 0 : index
    %c0_5 = arith.constant 0 : index
    %36 = vector.load %arg3[%c0_3, %c0_4, %c0_5] : memref<3x120x128xf32, #tpu.memory_space<vmem>>, vector<1x120x128xf32>
    %37 = vector.shape_cast %36 : vector<1x120x128xf32> to vector<120x128xf32>
    %cst = arith.constant dense<0.000000e+00> : vector<16x128xf32>
    %38 = tpu.matmul %35, %37, %cst {dimension_numbers = #tpu.dot_dimension_numbers<[1], [0], [0], [1], [0, 0, 1, 1], [], []>} : vector<16x120xf32>, vector<120x128xf32>, vector<16x128xf32> -> vector<16x128xf32>
    %39 = tpu.concatenate %20, %27 in 0 : vector<8x120xf32>, vector<8x120xf32> -> vector<16x120xf32>
    %c1 = arith.constant 1 : index
    %c0_6 = arith.constant 0 : index
    %c0_7 = arith.constant 0 : index
    %40 = vector.load %arg3[%c1, %c0_6, %c0_7] : memref<3x120x128xf32, #tpu.memory_space<vmem>>, vector<1x120x128xf32>
    %41 = vector.shape_cast %40 : vector<1x120x128xf32> to vector<120x128xf32>
    %cst_8 = arith.constant dense<0.000000e+00> : vector<16x128xf32>
    %42 = tpu.matmul %39, %41, %cst_8 {dimension_numbers = #tpu.dot_dimension_numbers<[1], [0], [0], [1], [0, 0, 1, 1], [], []>} : vector<16x120xf32>, vector<120x128xf32>, vector<16x128xf32> -> vector<16x128xf32>
    %43 = arith.addf %38, %42 : vector<16x128xf32>
    %44 = tpu.concatenate %27, %34 in 0 : vector<8x120xf32>, vector<8x120xf32> -> vector<16x120xf32>
    %c2 = arith.constant 2 : index
    %c0_9 = arith.constant 0 : index
    %c0_10 = arith.constant 0 : index
    %45 = vector.load %arg3[%c2, %c0_9, %c0_10] : memref<3x120x128xf32, #tpu.memory_space<vmem>>, vector<1x120x128xf32>
    %46 = vector.shape_cast %45 : vector<1x120x128xf32> to vector<120x128xf32>
    %cst_11 = arith.constant dense<0.000000e+00> : vector<16x128xf32>
    %47 = tpu.matmul %44, %46, %cst_11 {dimension_numbers = #tpu.dot_dimension_numbers<[1], [0], [0], [1], [0, 0, 1, 1], [], []>} : vector<16x120xf32>, vector<120x128xf32>, vector<16x128xf32> -> vector<16x128xf32>
    %48 = arith.addf %43, %47 : vector<16x128xf32>
    %c0_12 = arith.constant 0 : index
    %c0_13 = arith.constant 0 : index
    %c0_14 = arith.constant 0 : index
    %49 = vector.load %arg4[%c0_12, %c0_13, %c0_14] : memref<1x1x128xf32, #tpu.memory_space<vmem>>, vector<1x1x128xf32>
    %50 = vector.shape_cast %49 : vector<1x1x128xf32> to vector<1x128xf32>
    %cst_15 = arith.constant dense<0.000000e+00> : vector<128xf32>
    %51 = vector.multi_reduction <add>, %48, %cst_15 [0] : vector<16x128xf32> to vector<128xf32>
    %52 = vector.shape_cast %51 : vector<128xf32> to vector<1x128xf32>
    %53 = arith.addf %50, %52 : vector<1x128xf32>
    %c0_16 = arith.constant 0 : index
    %c0_17 = arith.constant 0 : index
    %c0_18 = arith.constant 0 : index
    %54 = vector.load %arg4[%c0_16, %c0_17, %c0_18] : memref<1x1x128xf32, #tpu.memory_space<vmem>>, vector<1x1x128xf32>
    %55 = vector.shape_cast %54 : vector<1x1x128xf32> to vector<1x128xf32>
    %56 = vector.shape_cast %53 : vector<1x128xf32> to vector<1x1x128xf32>
    tpu.vector_store %arg4[%c0_16, %c0_17, %c0_18], %56 {strides = array<i32>} : memref<1x1x128xf32, #tpu.memory_space<vmem>>, vector<1x1x128xf32>,
    %c0_19 = arith.constant 0 : index
    %c0_20 = arith.constant 0 : index
    %c0_21 = arith.constant 0 : index
    %57 = vector.load %arg5[%c0_19, %c0_20, %c0_21] : memref<1x1x128xf32, #tpu.memory_space<vmem>>, vector<1x1x128xf32>
    %58 = vector.shape_cast %57 : vector<1x1x128xf32> to vector<1x128xf32>
    %59 = arith.mulf %48, %48 : vector<16x128xf32>
    %cst_22 = arith.constant dense<0.000000e+00> : vector<128xf32>
    %60 = vector.multi_reduction <add>, %59, %cst_22 [0] : vector<16x128xf32> to vector<128xf32>
    %61 = vector.shape_cast %60 : vector<128xf32> to vector<1x128xf32>
    %62 = arith.addf %58, %61 : vector<1x128xf32>
    %c0_23 = arith.constant 0 : index
    %c0_24 = arith.constant 0 : index
    %c0_25 = arith.constant 0 : index
    %63 = vector.load %arg5[%c0_23, %c0_24, %c0_25] : memref<1x1x128xf32, #tpu.memory_space<vmem>>, vector<1x1x128xf32>
    %64 = vector.shape_cast %63 : vector<1x1x128xf32> to vector<1x128xf32>
    %65 = vector.shape_cast %62 : vector<1x128xf32> to vector<1x1x128xf32>
    tpu.vector_store %arg5[%c0_23, %c0_24, %c0_25], %65 {strides = array<i32>} : memref<1x1x128xf32, #tpu.memory_space<vmem>>, vector<1x1x128xf32>,
    return
  }
  func.func @transform_0(%arg0: i32, %arg1: i32) -> (i32, i32, i32, i32) {
    %c0_i32 = arith.constant 0 : i32
    %c0_i32_0 = arith.constant 0 : i32
    %c0_i32_1 = arith.constant 0 : i32
    %c0_i32_2 = arith.constant 0 : i32
    return %arg0, %c0_i32, %c0_i32_0, %c0_i32_1 : i32, i32, i32, i32
  }
  func.func @transform_1(%arg0: i32, %arg1: i32) -> (i32, i32, i32) {
    %c0_i32 = arith.constant 0 : i32
    %c0_i32_0 = arith.constant 0 : i32
    %c0_i32_1 = arith.constant 0 : i32
    %c0_i32_2 = arith.constant 0 : i32
    return %c0_i32, %c0_i32_0, %c0_i32_1 : i32, i32, i32
  }
  func.func @transform_2(%arg0: i32, %arg1: i32) -> (i32, i32, i32) {
    %c0_i32 = arith.constant 0 : i32
    %c0_i32_0 = arith.constant 0 : i32
    %c0_i32_1 = arith.constant 0 : i32
    return %arg0, %c0_i32, %c0_i32_0 : i32, i32, i32
  }
  func.func @transform_3(%arg0: i32, %arg1: i32) -> (i32, i32, i32) {
    %c0_i32 = arith.constant 0 : i32
    %c0_i32_0 = arith.constant 0 : i32
    %c0_i32_1 = arith.constant 0 : i32
    return %arg0, %c0_i32, %c0_i32_0 : i32, i32, i32
  }
}

module attributes {stable_mosaic.version = 11 : i64} {
  func.func @kernel(%arg0: i32, %arg1: i32, %arg2: memref<1x6x10x40xf32, #tpu.memory_space<vmem>>, %arg3: memref<3x120x128xf32, #tpu.memory_space<vmem>>, %arg4: memref<1x128xf32, #tpu.memory_space<vmem>>, %arg5: memref<1x128xf32, #tpu.memory_space<vmem>>, %arg6: memref<1x2x8x128xf32, #tpu.memory_space<vmem>>) attributes {dimension_semantics = [#tpu.dimension_semantics<parallel>, #tpu.dimension_semantics<parallel>], iteration_bounds = array<i64: 2, 2>, scalar_prefetch = 0 : i64, scratch_operands = 0 : i64, tpu.core_type = #tpu.core_type<tc>, window_params = [{transform_indices = @transform_0, window_bounds = array<i64: 1, 6, 10, 40>}, {pipeline_mode = #tpu.pipeline_mode<synchronous>, transform_indices = @transform_1, window_bounds = array<i64: 3, 120, 128>}, {pipeline_mode = #tpu.pipeline_mode<synchronous>, transform_indices = @transform_2, window_bounds = array<i64: 1, 128>}, {pipeline_mode = #tpu.pipeline_mode<synchronous>, transform_indices = @transform_3, window_bounds = array<i64: 1, 128>}, {transform_indices = @transform_4, window_bounds = array<i64: 1, 2, 8, 128>}]} {
    %c2_i32 = arith.constant 2 : i32
    %0 = arith.muli %arg1, %c2_i32 : i32
    %c0 = arith.constant 0 : index
    %1 = arith.index_cast %0 : i32 to index
    %c0_0 = arith.constant 0 : index
    %c0_1 = arith.constant 0 : index
    %2 = vector.load %arg2[%c0, %1, %c0_0, %c0_1] : memref<1x6x10x40xf32, #tpu.memory_space<vmem>>, vector<1x4x10x40xf32>
    %3 = vector.shape_cast %2 : vector<1x4x10x40xf32> to vector<4x10x40xf32>
    %4 = vector.extract_strided_slice %3 {offsets = [0, 0, 0], sizes = [1, 8, 40], strides = [1, 1, 1]} : vector<4x10x40xf32> to vector<1x8x40xf32>
    %5 = vector.shape_cast %4 : vector<1x8x40xf32> to vector<8x40xf32>
    %6 = vector.extract_strided_slice %3 {offsets = [0, 1, 0], sizes = [1, 8, 40], strides = [1, 1, 1]} : vector<4x10x40xf32> to vector<1x8x40xf32>
    %7 = vector.shape_cast %6 : vector<1x8x40xf32> to vector<8x40xf32>
    %8 = vector.extract_strided_slice %3 {offsets = [0, 2, 0], sizes = [1, 8, 40], strides = [1, 1, 1]} : vector<4x10x40xf32> to vector<1x8x40xf32>
    %9 = vector.shape_cast %8 : vector<1x8x40xf32> to vector<8x40xf32>
    %10 = tpu.concatenate %5, %7, %9 in 1 : vector<8x40xf32>, vector<8x40xf32>, vector<8x40xf32> -> vector<8x120xf32>
    %11 = vector.extract_strided_slice %3 {offsets = [1, 0, 0], sizes = [1, 8, 40], strides = [1, 1, 1]} : vector<4x10x40xf32> to vector<1x8x40xf32>
    %12 = vector.shape_cast %11 : vector<1x8x40xf32> to vector<8x40xf32>
    %13 = vector.extract_strided_slice %3 {offsets = [1, 1, 0], sizes = [1, 8, 40], strides = [1, 1, 1]} : vector<4x10x40xf32> to vector<1x8x40xf32>
    %14 = vector.shape_cast %13 : vector<1x8x40xf32> to vector<8x40xf32>
    %15 = vector.extract_strided_slice %3 {offsets = [1, 2, 0], sizes = [1, 8, 40], strides = [1, 1, 1]} : vector<4x10x40xf32> to vector<1x8x40xf32>
    %16 = vector.shape_cast %15 : vector<1x8x40xf32> to vector<8x40xf32>
    %17 = tpu.concatenate %12, %14, %16 in 1 : vector<8x40xf32>, vector<8x40xf32>, vector<8x40xf32> -> vector<8x120xf32>
    %18 = vector.extract_strided_slice %3 {offsets = [2, 0, 0], sizes = [1, 8, 40], strides = [1, 1, 1]} : vector<4x10x40xf32> to vector<1x8x40xf32>
    %19 = vector.shape_cast %18 : vector<1x8x40xf32> to vector<8x40xf32>
    %20 = vector.extract_strided_slice %3 {offsets = [2, 1, 0], sizes = [1, 8, 40], strides = [1, 1, 1]} : vector<4x10x40xf32> to vector<1x8x40xf32>
    %21 = vector.shape_cast %20 : vector<1x8x40xf32> to vector<8x40xf32>
    %22 = vector.extract_strided_slice %3 {offsets = [2, 2, 0], sizes = [1, 8, 40], strides = [1, 1, 1]} : vector<4x10x40xf32> to vector<1x8x40xf32>
    %23 = vector.shape_cast %22 : vector<1x8x40xf32> to vector<8x40xf32>
    %24 = tpu.concatenate %19, %21, %23 in 1 : vector<8x40xf32>, vector<8x40xf32>, vector<8x40xf32> -> vector<8x120xf32>
    %25 = vector.extract_strided_slice %3 {offsets = [3, 0, 0], sizes = [1, 8, 40], strides = [1, 1, 1]} : vector<4x10x40xf32> to vector<1x8x40xf32>
    %26 = vector.shape_cast %25 : vector<1x8x40xf32> to vector<8x40xf32>
    %27 = vector.extract_strided_slice %3 {offsets = [3, 1, 0], sizes = [1, 8, 40], strides = [1, 1, 1]} : vector<4x10x40xf32> to vector<1x8x40xf32>
    %28 = vector.shape_cast %27 : vector<1x8x40xf32> to vector<8x40xf32>
    %29 = vector.extract_strided_slice %3 {offsets = [3, 2, 0], sizes = [1, 8, 40], strides = [1, 1, 1]} : vector<4x10x40xf32> to vector<1x8x40xf32>
    %30 = vector.shape_cast %29 : vector<1x8x40xf32> to vector<8x40xf32>
    %31 = tpu.concatenate %26, %28, %30 in 1 : vector<8x40xf32>, vector<8x40xf32>, vector<8x40xf32> -> vector<8x120xf32>
    %32 = tpu.concatenate %10, %17 in 0 : vector<8x120xf32>, vector<8x120xf32> -> vector<16x120xf32>
    %c0_2 = arith.constant 0 : index
    %c0_3 = arith.constant 0 : index
    %c0_4 = arith.constant 0 : index
    %33 = vector.load %arg3[%c0_2, %c0_3, %c0_4] : memref<3x120x128xf32, #tpu.memory_space<vmem>>, vector<1x120x128xf32>
    %34 = vector.shape_cast %33 : vector<1x120x128xf32> to vector<120x128xf32>
    %cst = arith.constant dense<0.000000e+00> : vector<16x128xf32>
    %35 = tpu.matmul %32, %34, %cst {dimension_numbers = #tpu.dot_dimension_numbers<[1], [0], [0], [1], [0, 0, 1, 1], [], []>} : vector<16x120xf32>, vector<120x128xf32>, vector<16x128xf32> -> vector<16x128xf32>
    %36 = tpu.concatenate %17, %24 in 0 : vector<8x120xf32>, vector<8x120xf32> -> vector<16x120xf32>
    %c1 = arith.constant 1 : index
    %c0_5 = arith.constant 0 : index
    %c0_6 = arith.constant 0 : index
    %37 = vector.load %arg3[%c1, %c0_5, %c0_6] : memref<3x120x128xf32, #tpu.memory_space<vmem>>, vector<1x120x128xf32>
    %38 = vector.shape_cast %37 : vector<1x120x128xf32> to vector<120x128xf32>
    %cst_7 = arith.constant dense<0.000000e+00> : vector<16x128xf32>
    %39 = tpu.matmul %36, %38, %cst_7 {dimension_numbers = #tpu.dot_dimension_numbers<[1], [0], [0], [1], [0, 0, 1, 1], [], []>} : vector<16x120xf32>, vector<120x128xf32>, vector<16x128xf32> -> vector<16x128xf32>
    %40 = arith.addf %35, %39 : vector<16x128xf32>
    %41 = tpu.concatenate %24, %31 in 0 : vector<8x120xf32>, vector<8x120xf32> -> vector<16x120xf32>
    %c2 = arith.constant 2 : index
    %c0_8 = arith.constant 0 : index
    %c0_9 = arith.constant 0 : index
    %42 = vector.load %arg3[%c2, %c0_8, %c0_9] : memref<3x120x128xf32, #tpu.memory_space<vmem>>, vector<1x120x128xf32>
    %43 = vector.shape_cast %42 : vector<1x120x128xf32> to vector<120x128xf32>
    %cst_10 = arith.constant dense<0.000000e+00> : vector<16x128xf32>
    %44 = tpu.matmul %41, %43, %cst_10 {dimension_numbers = #tpu.dot_dimension_numbers<[1], [0], [0], [1], [0, 0, 1, 1], [], []>} : vector<16x120xf32>, vector<120x128xf32>, vector<16x128xf32> -> vector<16x128xf32>
    %45 = arith.addf %40, %44 : vector<16x128xf32>
    %c0_11 = arith.constant 0 : index
    %c0_12 = arith.constant 0 : index
    %46 = vector.load %arg4[%c0_11, %c0_12] : memref<1x128xf32, #tpu.memory_space<vmem>>, vector<1x128xf32>
    %47 = vector.broadcast %46 : vector<1x128xf32> to vector<16x128xf32>
    %48 = arith.mulf %45, %47 : vector<16x128xf32>
    %c0_13 = arith.constant 0 : index
    %c0_14 = arith.constant 0 : index
    %49 = vector.load %arg5[%c0_13, %c0_14] : memref<1x128xf32, #tpu.memory_space<vmem>>, vector<1x128xf32>
    %50 = vector.broadcast %49 : vector<1x128xf32> to vector<16x128xf32>
    %51 = arith.addf %48, %50 : vector<16x128xf32>
    %cst_15 = arith.constant 0.000000e+00 : f32
    %52 = vector.broadcast %cst_15 : f32 to vector<16x128xf32>
    %53 = arith.maximumf %51, %52 : vector<16x128xf32>
    %54 = vector.shape_cast %53 : vector<16x128xf32> to vector<2x8x128xf32>
    %c0_16 = arith.constant 0 : index
    %c0_17 = arith.constant 0 : index
    %c0_18 = arith.constant 0 : index
    %c0_19 = arith.constant 0 : index
    %55 = vector.load %arg6[%c0_16, %c0_17, %c0_18, %c0_19] : memref<1x2x8x128xf32, #tpu.memory_space<vmem>>, vector<1x2x8x128xf32>
    %56 = vector.shape_cast %55 : vector<1x2x8x128xf32> to vector<2x8x128xf32>
    %57 = vector.shape_cast %54 : vector<2x8x128xf32> to vector<1x2x8x128xf32>
    tpu.vector_store %arg6[%c0_16, %c0_17, %c0_18, %c0_19], %57 {strides = array<i32>} : memref<1x2x8x128xf32, #tpu.memory_space<vmem>>, vector<1x2x8x128xf32>,
    return
  }
  func.func @transform_0(%arg0: i32, %arg1: i32) -> (i32, i32, i32, i32) {
    %c0_i32 = arith.constant 0 : i32
    %c0_i32_0 = arith.constant 0 : i32
    %c0_i32_1 = arith.constant 0 : i32
    %c0_i32_2 = arith.constant 0 : i32
    return %arg0, %c0_i32, %c0_i32_0, %c0_i32_1 : i32, i32, i32, i32
  }
  func.func @transform_1(%arg0: i32, %arg1: i32) -> (i32, i32, i32) {
    %c0_i32 = arith.constant 0 : i32
    %c0_i32_0 = arith.constant 0 : i32
    %c0_i32_1 = arith.constant 0 : i32
    %c0_i32_2 = arith.constant 0 : i32
    return %c0_i32, %c0_i32_0, %c0_i32_1 : i32, i32, i32
  }
  func.func @transform_2(%arg0: i32, %arg1: i32) -> (i32, i32) {
    %c0_i32 = arith.constant 0 : i32
    %c0_i32_0 = arith.constant 0 : i32
    %c0_i32_1 = arith.constant 0 : i32
    return %c0_i32, %c0_i32_0 : i32, i32
  }
  func.func @transform_3(%arg0: i32, %arg1: i32) -> (i32, i32) {
    %c0_i32 = arith.constant 0 : i32
    %c0_i32_0 = arith.constant 0 : i32
    %c0_i32_1 = arith.constant 0 : i32
    return %c0_i32, %c0_i32_0 : i32, i32
  }
  func.func @transform_4(%arg0: i32, %arg1: i32) -> (i32, i32, i32, i32) {
    %c0_i32 = arith.constant 0 : i32
    %c0_i32_0 = arith.constant 0 : i32
    %c0_i32_1 = arith.constant 0 : i32
    return %arg0, %arg1, %c0_i32, %c0_i32_0 : i32, i32, i32, i32
  }
}

</mosaic_0001>

<bundles_post_ra>
// kernel: tile.13
= control target key start
LH: loop header
LB: loop body
LE: loop exit
PB: predicated region body
PF: predicated region fallthrough
CT: control target
= control target key end

     0   :  { %s22_s0 = inlined_call_operand.vmem [shape: f32[16], index: 0, kind: input, shape index: {}]   ;;  %s23_s1 = inlined_call_operand.vmem [shape: f32[8,16], index: 1, kind: output, shape index: {}]  }
   0x1   :  { %v4_v0 = vld [vmem:[%s22_s0] ss:$0 sm:$0xff] }
   0x2   :  { %5 = vst [vmem:[%s23_s1] sm:$0xff] %v4_v0 }

// kernel: tile.14
= control target key start
LH: loop header
LB: loop body
LE: loop exit
PB: predicated region body
PF: predicated region fallthrough
CT: control target
= control target key end

     0   :  { %s69_s10 = smov 112   ;;  %s70_s11 = smov 80   ;;  %vm3_vm0 = vcmask 130048   ;;  %vm9_vm1 = vcmask 1048448   ;;  %vm15_vm2 = vcmask 917248   ;;  %vm21_vm3 = vcmask 786048   ;;  %s113_s0 = inlined_call_operand.vmem [shape: f32[8,16], index: 0, kind: input, shape index: {}]   ;;  %s114_s1 = inlined_call_operand.vmem [shape: f32[1,128], index: 1, kind: output, shape index: {}]  }
   0x1   :  { %v55_v0 = vld [vmem:[%s113_s0 + $0x7] sm:$0x1]   ;;  %v57_v1 = vld [vmem:[%s113_s0 + $0x5] sm:$0x1]   ;;  %v56_v2 = vld [vmem:[%s113_s0 + $0x6] sm:$0x1]  }
   0x2   :  { %7 = vrot.lane.b32.xlu0 %v55_v0, %s69_s10  ;;  %19 = vrot.lane.b32.xlu1 %v57_v1, %s70_s11  ;;  %v58_v3 = vld [vmem:[%s113_s0 + $0x4] sm:$0x1]   ;;  %v2_v4 = vld [vmem:[%s113_s0] sm:$0x1]   ;;  %s71_s18 = smov 96   ;;  %s72_s19 = smov 64  }
   0x3   :  { %4 = vst.msk [vmem:[#allocation0] sm:$0x1] %vm3_vm0, %v2_v4   ;;  %v59_v5 = vld [vmem:[%s113_s0 + $0x3] sm:$0x1]   ;;  %v60_v6 = vld [vmem:[%s113_s0 + $0x2] sm:$0x1]  }
   0x4   :  { %s73_s24 = smov 48   ;;  %s74_s25 = smov 32   ;;  %v61_v7 = vld [vmem:[%s113_s0 + $0x1] sm:$0x1]   ;;  %vm27_vm4 = vcmask 654848   ;;  %vm33_vm5 = vcmask 523648  }
   0x5   :  { %s75_s0 = smov 16   ;;  %vm39_vm6 = vcmask 392448   ;;  %vm45_vm7 = vcmask 261248  }
   0x6   :  { %13 = vrot.lane.b32.xlu0 %v56_v2, %s71_s18  ;;  %25 = vrot.lane.b32.xlu1 %v58_v3, %s72_s19 }
   0xa   :  { %31 = vrot.lane.b32.xlu0 %v59_v5, %s73_s24  ;;  %37 = vrot.lane.b32.xlu1 %v60_v6, %s74_s25 }
   0xe   :  { %43 = vrot.lane.b32.xlu0 %v61_v7, %s75_s0 }
  0x74   :  { %v8_v8 = vpop.permute.xlu0 %7   ;;  %v20_v9 = vpop.permute.xlu1 %19  }
  0x75   :  { %10 = vst.msk [vmem:[#allocation0] sm:$0x1] %vm9_vm1, %v8_v8  }
  0x78   :  { %v14_v10 = vpop.permute.xlu0 %13   ;;  %v26_v11 = vpop.permute.xlu1 %25  }
  0x79   :  { %16 = vst.msk [vmem:[#allocation0] sm:$0x1] %vm15_vm2, %v14_v10  }
  0x7a   :  { %22 = vst.msk [vmem:[#allocation0] sm:$0x1] %vm21_vm3, %v20_v9  }
  0x7b   :  { %28 = vst.msk [vmem:[#allocation0] sm:$0x1] %vm27_vm4, %v26_v11  }
  0x7c   :  { %v32_v12 = vpop.permute.xlu0 %31   ;;  %v38_v13 = vpop.permute.xlu1 %37  }
  0x7d   :  { %34 = vst.msk [vmem:[#allocation0] sm:$0x1] %vm33_vm5, %v32_v12  }
  0x7e   :  { %40 = vst.msk [vmem:[#allocation0] sm:$0x1] %vm39_vm6, %v38_v13  }
  0x80   :  { %v44_v14 = vpop.permute.xlu0 %43  }
  0x81   :  { %46 = vst.msk [vmem:[#allocation0] sm:$0x1] %vm45_vm7, %v44_v14  }
  0x88   :  { %v51_v15 = vld [vmem:[#allocation0] sm:$0x1] }
  0x89   :  { %54 = vst [vmem:[%s114_s1] sm:$0x1] %v51_v15 }

// kernel: _lambda_.3
= control target key start
LH: loop header
LB: loop body
LE: loop exit
PB: predicated region body
PF: predicated region fallthrough
CT: control target
= control target key end

     0   :  { %s1007_s15 = smov 0   ;;  %s1009_s16 = smov 0   ;;  %s1267_s0 = inlined_call_operand.vmem [shape: f32[2,6,10,40], index: 0, kind: input, shape index: {}]   ;;  %s1268_s1 = inlined_call_operand.vmem [shape: f32[3,120,128], index: 1, kind: input, shape index: {}]   ;;  %s1269_s2 = inlined_call_operand.vmem [shape: f32[1,128], index: 2, kind: input, shape index: {}]   ;;  %s1270_s3 = inlined_call_operand.vmem [shape: f32[1,128], index: 3, kind: input, shape index: {}]   ;;  %s1271_s4 = inlined_call_operand.vmem [shape: f32[2,4,8,128], index: 4, kind: output, shape index: {}]  }
   0x1   :  { %s1011_s17 = smov 0   ;;  %s1013_s18 = smov 0  }
   0x2   :  { %s1015_s19 = smov 0  }
   0x3 LB: > { %s23_s20 = sadd.s32 1, %s970_s17  ;;  %s26_s21 = sadd.s32 1, %s974_s18  ;;  %s978_s19 = sphi %s1015_s19, %s14_s19   ;;  %s974_s18 = sphi %s1013_s18, %s1275_s18   ;;  %s970_s17 = sphi %s1011_s17, %s1274_s17   ;;  %s966_s16 = sphi %s1009_s16, %s1273_s16   ;;  %s962_s15 = sphi %s1007_s15, %s1272_s15  }
   0x4   : > { %p24_p0 = scmp.ge.s32.totalorder %s23_s20, 2  ;;  %p699_p1 = scmp.ge.s32.totalorder %s978_s19, 1 }
   0x5   : > { %p176_p2 = scmp.lt.s32.totalorder %s978_s19, 5 }
   0x6   : > { %s1277_s20 = smov (%p24_p0, %s23_s20), 0  ;;  %s1279_s21 = smov (!%p24_p0, %s26_s21), %s974_s18 }
   0x7   : > { %p177_p3 = pnand %p699_p1, %p176_p2  ;;  %p28_p4 = scmp.ge.s32.totalorder %s1279_s21, 2 }
   0x8   : > { %p206_p5 = scmp.lt.s32.totalorder (!%p177_p3), %s966_s16, 1  ;;  %s746_s9 = sshll.u32 (!%p177_p3), %s962_s15, 5 }
   0x9   : > { %s1281_s21 = smov (%p28_p4, %s1279_s21), 0  ;;  %180 = sbr.rel (%p177_p3) target bundleno = 381 (0x17d), region = 36 }
   0xe   : > { %v720_v0 = vld [vmem:[%s1268_s1 + $0xe8] sm:$0xff]  ;;  %v719_v1 = vld [vmem:[%s1268_s1 + $0xe0] sm:$0xff]  ;;  %v314_v2 = vld [vmem:[%s1268_s1 + $0x70] sm:$0xff]  ;;  %s1283_s16 = smov (!%p206_p5, %s966_s16), 1  ;;  %vm234_vm0 = vcmask 1046528   ;;  %vm241_vm1 = vcmask 1045504  }
   0xf   : > { %798 = vmatprep.subr.mxu0 %v720_v0  ;;  %v718_v3 = vld [vmem:[%s1268_s1 + $0xd8] sm:$0xff]  ;;  %831 = vmatprep.subr.mxu1 %v314_v2  ;;  %v313_v4 = vld [vmem:[%s1268_s1 + $0x68] sm:$0xff]  ;;  %v312_v5 = vld [vmem:[%s1268_s1 + $0x60] sm:$0xff]  ;;  %s897_s8 = smul.u32 96, %s1283_s16  ;;  %vm248_vm2 = vcmask 326656   ;;  %vm250_vm3 = vcmask 654336  }
  0x10   : > { %799 = vmatpush3.msra.mxu0 %v720_v0  ;;  %832 = vmatpush3.msra.mxu1 %v314_v2  ;;  %v717_v6 = vld [vmem:[%s1268_s1 + $0xd0] sm:$0xff]  ;;  %v311_v7 = vld [vmem:[%s1268_s1 + $0x58] sm:$0xff]  ;;  %v716_v8 = vld [vmem:[%s1268_s1 + $0xc8] sm:$0xff]  ;;  %vm331_vm4 = vcmask 982016  }
  0x11   : > { %800 = vmatprep.subr.mxu0 %v719_v1  ;;  %833 = vmatprep.subr.mxu1 %v313_v4  ;;  %s210_s23 = scalar_lea.vmem %s1267_s0, %s897_s8  ;;  %v715_v9 = vld [vmem:[%s1268_s1 + $0xc0] sm:$0xff]  ;;  %v310_v10 = vld [vmem:[%s1268_s1 + $0x50] sm:$0xff]  ;;  %v714_v24 = vld [vmem:[%s1268_s1 + $0xb8] sm:$0xff] }
  0x12   : > { %801 = vmatpush3.msra.mxu0 %v719_v1  ;;  %834 = vmatpush3.msra.mxu1 %v313_v4  ;;  %s1073_s26 = scalar_lea.vmem %s210_s23, %s746_s9  ;;  %v309_v27 = vld [vmem:[%s1268_s1 + $0x48] sm:$0xff]  ;;  %s980_s9 = smov 40   ;;  %v713_v29 = vld [vmem:[%s1268_s1 + $0xb0] sm:$0xff]  ;;  %v308_v39 = vld [vmem:[%s1268_s1 + $0x40] sm:$0xff] }
  0x13   : > { %802 = vmatprep.subr.mxu0 %v718_v3  ;;  %835 = vmatprep.subr.mxu1 %v312_v5  ;;  %v1082_v11 = vld [vmem:[%s1073_s26 + $0x20] sm:$0xff]  ;;  %v229_v12 = vld [vmem:[%s1073_s26 + $0x28] sm:$0x3]  ;;  %v1086_v13 = vld [vmem:[%s1073_s26 + $0x10] sm:$0xff]  ;;  %s981_s23 = smov 80  }
  0x14   : > { %803 = vmatpush3.msra.mxu0 %v718_v3  ;;  %836 = vmatpush3.msra.mxu1 %v312_v5  ;;  %v270_v14 = vrot.slane %v1082_v11, 1  ;;  %v271_v15 = vrot.slane %v229_v12, 1  ;;  %v227_v16 = vld [vmem:[%s1073_s26 + $0x18] sm:$0x3]  ;;  %v254_v17 = vrot.slane %v1086_v13, 1  ;;  %v276_v18 = vrot.slane %v1082_v11, 2 }
  0x15   : > { %804 = vmatprep.subr.mxu0 %v717_v6  ;;  %837 = vmatprep.subr.mxu1 %v311_v7  ;;  %v255_v19 = vrot.slane %v227_v16, 1  ;;  %v277_v20 = vrot.slane %v229_v12, 2  ;;  %v260_v21 = vrot.slane %v1086_v13, 2  ;;  %v261_v22 = vrot.slane %v227_v16, 2  ;;  %v1094_v23 = vld [vmem:[%s1073_s26] sm:$0xff]  ;;  %v1115_v36 = vld [vmem:[%s1073_s26 + $0x30] sm:$0xff] }
  0x16   : > { %805 = vmatpush3.msra.mxu0 %v717_v6  ;;  %838 = vmatpush3.msra.mxu1 %v311_v7  ;;  %v272_v25 = vsel %vm234_vm0, %v270_v14, %v271_v15  ;;  %v225_v26 = vld [vmem:[%s1073_s26 + $0x8] sm:$0x3]  ;;  %v242_v31 = vrot.slane %v1094_v23, 2  ;;  %v235_v34 = vrot.slane %v1094_v23, 1  ;;  %v231_v37 = vld [vmem:[%s1073_s26 + $0x38] sm:$0x3] }
  0x17   : > { %806 = vmatprep.subr.mxu0 %v716_v8  ;;  %839 = vmatprep.subr.mxu1 %v310_v10  ;;  %v256_v28 = vsel %vm234_vm0, %v254_v17, %v255_v19  ;;  %v278_v30 = vsel %vm241_vm1, %v276_v18, %v277_v20  ;;  %v243_v32 = vrot.slane %v225_v26, 2  ;;  %v262_v33 = vsel %vm241_vm1, %v260_v21, %v261_v22  ;;  %v712_v38 = vld [vmem:[%s1268_s1 + $0xa8] sm:$0xff]  ;;  %v711_v40 = vld [vmem:[%s1268_s1 + $0xa0] sm:$0xff]  ;;  %v710_v47 = vld [vmem:[%s1268_s1 + $0x98] sm:$0xff]  ;;  %s702_s26 = sshll.u32 %s1283_s16, 2 }
  0x18   : > { %807 = vmatpush3.msra.mxu0 %v716_v8  ;;  %840 = vmatpush3.msra.mxu1 %v310_v10  ;;  %v236_v35 = vrot.slane %v225_v26, 1  ;;  %v292_v42 = vrot.slane %v1115_v36, 2  ;;  %v293_v43 = vrot.slane %v231_v37, 2  ;;  %v286_v45 = vrot.slane %v1115_v36, 1  ;;  %v307_v48 = vld [vmem:[%s1268_s1 + $0x38] sm:$0xff]  ;;  %v709_v49 = vld [vmem:[%s1268_s1 + $0x90] sm:$0xff] }
  0x19   : > { %808 = vmatprep.subr.mxu0 %v715_v9  ;;  %273 = vrot.lane.b32.xlu1 %v272_v25, %s980_s9  ;;  %v244_v41 = vsel %vm241_vm1, %v242_v31, %v243_v32  ;;  %v287_v46 = vrot.slane %v231_v37, 1  ;;  %v306_v51 = vld [vmem:[%s1268_s1 + $0x30] sm:$0xff]  ;;  %v708_v53 = vld [vmem:[%s1268_s1 + $0x88] sm:$0xff]  ;;  %v707_v55 = vld [vmem:[%s1268_s1 + $0x80] sm:$0xff] }
  0x1a   : > { %809 = vmatpush3.msra.mxu0 %v715_v9  ;;  %257 = vrot.lane.b32.xlu0 %v256_v28, %s980_s9  ;;  %v237_v44 = vsel %vm234_vm0, %v235_v34, %v236_v35  ;;  %v294_v50 = vsel %vm241_vm1, %v292_v42, %v293_v43  ;;  %v305_v54 = vld [vmem:[%s1268_s1 + $0x28] sm:$0xff]  ;;  %v304_v56 = vld [vmem:[%s1268_s1 + $0x20] sm:$0xff]  ;;  %v706_v57 = vld [vmem:[%s1268_s1 + $0x78] sm:$0xff] }
  0x1b   : > { %810 = vmatprep.subr.mxu0 %v714_v24  ;;  %841 = vmatprep.subr.mxu1 %v309_v27  ;;  %v288_v52 = vsel %vm234_vm0, %v286_v45, %v287_v46  ;;  %v303_v58 = vld [vmem:[%s1268_s1 + $0x18] sm:$0xff]  ;;  %v739_v59 = vld [vmem:[%s1268_s1 + $0x160] sm:$0xff]  ;;  %v302_v60 = vld [vmem:[%s1268_s1 + $0x10] sm:$0xff] }
  0x1c   : > { %811 = vmatpush3.msra.mxu0 %v714_v24  ;;  %842 = vmatpush3.msra.mxu1 %v309_v27  ;;  %v301_v61 = vld [vmem:[%s1268_s1 + $0x8] sm:$0xff]  ;;  %v300_v62 = vld [vmem:[%s1268_s1] sm:$0xff]  ;;  %v738_v7 = vld [vmem:[%s1268_s1 + $0x158] sm:$0xff] }
  0x1d   : > { %812 = vmatprep.subr.mxu0 %v713_v29  ;;  %279 = vrot.lane.b32.xlu1 %v278_v30, %s981_s23  ;;  %v737_v10 = vld [vmem:[%s1268_s1 + $0x150] sm:$0xff]  ;;  %v735_v14 = vld [vmem:[%s1268_s1 + $0x140] sm:$0xff]  ;;  %v734_v15 = vld [vmem:[%s1268_s1 + $0x138] sm:$0xff] }
  0x1e   : > { %813 = vmatpush3.msra.mxu0 %v713_v29  ;;  %263 = vrot.lane.b32.xlu0 %v262_v33, %s981_s23  ;;  %v733_v16 = vld [vmem:[%s1268_s1 + $0x130] sm:$0xff]  ;;  %v732_v17 = vld [vmem:[%s1268_s1 + $0x128] sm:$0xff]  ;;  %v731_v18 = vld [vmem:[%s1268_s1 + $0x120] sm:$0xff] }
  0x1f   : > { %814 = vmatprep.subr.mxu0 %v712_v38  ;;  %843 = vmatprep.subr.mxu1 %v308_v39  ;;  %v730_v19 = vld [vmem:[%s1268_s1 + $0x118] sm:$0xff]  ;;  %v729_v20 = vld [vmem:[%s1268_s1 + $0x110] sm:$0xff]  ;;  %v728_v21 = vld [vmem:[%s1268_s1 + $0x108] sm:$0xff] }
  0x20   : > { %815 = vmatpush3.msra.mxu0 %v712_v38  ;;  %844 = vmatpush3.msra.mxu1 %v308_v39  ;;  %v727_v22 = vld [vmem:[%s1268_s1 + $0x100] sm:$0xff]  ;;  %v726_v24 = vld [vmem:[%s1268_s1 + $0xf8] sm:$0xff]  ;;  %v725_v27 = vld [vmem:[%s1268_s1 + $0xf0] sm:$0xff] }
  0x21   : > { %816 = vmatprep.subr.mxu0 %v711_v40  ;;  %245 = vrot.lane.b32.xlu1 %v244_v41, %s981_s23  ;;  %v742_v35 = vld [vmem:[%s1269_s2] ss:$0 sm:$0xff] }
  0x22   : > { %817 = vmatpush3.msra.mxu0 %v711_v40  ;;  %238 = vrot.lane.b32.xlu0 %v237_v44, %s980_s9  ;;  %v743_v38 = vld [vmem:[%s1270_s3] ss:$0 sm:$0xff] }
  0x23   : > { %818 = vmatprep.subr.mxu0 %v710_v47  ;;  %845 = vmatprep.subr.mxu1 %v307_v48 }
  0x24   : > { %819 = vmatpush3.msra.mxu0 %v710_v47  ;;  %846 = vmatpush3.msra.mxu1 %v307_v48 }
  0x25   : > { %820 = vmatprep.subr.mxu0 %v709_v49  ;;  %295 = vrot.lane.b32.xlu1 %v294_v50, %s981_s23 }
  0x26   : > { %847 = vmatprep.subr.mxu1 %v306_v51  ;;  %289 = vrot.lane.b32.xlu0 %v288_v52, %s980_s9  ;;  %s701_s9 = sshll.u32 %s962_s15, 1 }
  0x27   : > { %821 = vmatpush3.msra.mxu0 %v709_v49  ;;  %848 = vmatpush3.msra.mxu1 %v306_v51  ;;  %p214_p6 = scmp.lt.s32.totalorder %s701_s9, 3 }
  0x28   : > { %822 = vmatprep.subr.mxu0 %v708_v53  ;;  %849 = vmatprep.subr.mxu1 %v305_v54 }
  0x29   : > { %823 = vmatpush3.msra.mxu0 %v708_v53  ;;  %850 = vmatpush3.msra.mxu1 %v305_v54  ;;  %s1285_s9 = smov (!%p214_p6, %s701_s9), 3 }
  0x2a   : > { %824 = vmatprep.subr.mxu0 %v707_v55  ;;  %851 = vmatprep.subr.mxu1 %v304_v56  ;;  %s217_s27 = sadd.s32 %s702_s26, %s1285_s9 }
  0x2b   : > { %825 = vmatpush3.msra.mxu0 %v707_v55  ;;  %852 = vmatpush3.msra.mxu1 %v304_v56  ;;  %s703_s15 = sshll.u32 %s217_s27, 3 }
  0x2c   : > { %826 = vmatprep.subr.mxu0 %v706_v57  ;;  %853 = vmatprep.subr.mxu1 %v303_v58  ;;  %s219_s7 = scalar_lea.vmem %s1271_s4, %s703_s15 }
  0x2d   : > { %827 = vmatpush3.msra.mxu0 %v706_v57  ;;  %854 = vmatpush3.msra.mxu1 %v303_v58 }
  0x2e   : > { %864 = vmatprep.subr.mxu0 %v739_v59  ;;  %855 = vmatprep.subr.mxu1 %v302_v60 }
  0x2f   : > { %856 = vmatpush3.msra.mxu1 %v302_v60 }
  0x30   : > { %857 = vmatprep.subr.mxu1 %v301_v61 }
  0x31   : > { %858 = vmatpush3.msra.mxu1 %v301_v61 }
  0x32   : > { %859 = vmatprep.subr.mxu1 %v300_v62 }
  0x33   : > { %860 = vmatpush3.msra.mxu1 %v300_v62 }
  0x8b   : > { %v274_v63 = vpop.permute.xlu1 %273 }
  0x8c   : > { %v258_v0 = vpop.permute.xlu0 %257  ;;  %v282_v1 = vsel %vm248_vm2, %v1082_v11, %v274_v63 }
  0x8d   : > { %v266_v3 = vsel %vm248_vm2, %v1086_v13, %v258_v0  ;;  %v736_v13 = vld [vmem:[%s1268_s1 + $0x148] sm:$0xff] }
  0x8f   : > { %v280_v2 = vpop.permute.xlu1 %279 }
  0x90   : > { %v283_v4 = vsel %vm250_vm3, %v282_v1, %v280_v2  ;;  %v264_v5 = vpop.permute.xlu0 %263 }
  0x91   : > { %v267_v6 = vsel %vm250_vm3, %v266_v3, %v264_v5 }
  0x92   : > { %828 = vmatprep.mubr.msk.f32.mxu0 %vm331_vm4, %v267_v6 }
  0x93   : > { %829 = vmatmul.mubr.msk.f32.vlgmr.msra.gmra.mxu0 %vm331_vm4, %v283_v4  ;;  %v246_v8 = vpop.permute.xlu1 %245 }
  0x94   : > { %865 = vmatpush3.msra.mxu0 %v739_v59  ;;  %894 = vmatprep.mubr.msk.f32.mxu0 %vm331_vm4, %v283_v4  ;;  %v239_v9 = vpop.permute.xlu0 %238 }
  0x95   : > { %866 = vmatprep.subr.mxu0 %v738_v7  ;;  %v249_v11 = vsel %vm248_vm2, %v1094_v23, %v239_v9 }
  0x96   : > { %867 = vmatpush3.msra.mxu0 %v738_v7  ;;  %v251_v12 = vsel %vm250_vm3, %v249_v11, %v246_v8 }
  0x97   : > { %868 = vmatprep.subr.mxu0 %v737_v10  ;;  %861 = vmatprep.mubr.msk.f32.mxu1 %vm331_vm4, %v251_v12  ;;  %v296_v26 = vpop.permute.xlu1 %295 }
  0x98   : > { %869 = vmatpush3.msra.mxu0 %v737_v10  ;;  %862 = vmatmul.mubr.msk.f32.vlgmr.msra.gmra.mxu1 %vm331_vm4, %v267_v6  ;;  %v290_v23 = vpop.permute.xlu0 %289 }
  0x99   : > { %870 = vmatprep.subr.mxu0 %v736_v13  ;;  %v298_v25 = vsel %vm248_vm2, %v1115_v36, %v290_v23 }
  0x9a   : > { %871 = vmatpush3.msra.mxu0 %v736_v13  ;;  %v299_v28 = vsel %vm250_vm3, %v298_v25, %v296_v26 }
  0x9b   : > { %872 = vmatprep.subr.mxu0 %v735_v14 }
  0x9c   : > { %873 = vmatpush3.msra.mxu0 %v735_v14 }
  0x9d   : > { %874 = vmatprep.subr.mxu0 %v734_v15 }
  0x9e   : > { %875 = vmatpush3.msra.mxu0 %v734_v15 }
  0x9f   : > { %876 = vmatprep.subr.mxu0 %v733_v16 }
  0xa0   : > { %877 = vmatpush3.msra.mxu0 %v733_v16 }
  0xa1   : > { %878 = vmatprep.subr.mxu0 %v732_v17 }
  0xa2   : > { %879 = vmatpush3.msra.mxu0 %v732_v17 }
  0xa3   : > { %880 = vmatprep.subr.mxu0 %v731_v18 }
  0xa4   : > { %881 = vmatpush3.msra.mxu0 %v731_v18 }
  0xa5   : > { %882 = vmatprep.subr.mxu0 %v730_v19 }
  0xa6   : > { %883 = vmatpush3.msra.mxu0 %v730_v19 }
  0xa7   : > { %884 = vmatprep.subr.mxu0 %v729_v20 }
  0xa8   : > { %885 = vmatpush3.msra.mxu0 %v729_v20 }
  0xa9   : > { %886 = vmatprep.subr.mxu0 %v728_v21 }
  0xaa   : > { %887 = vmatpush3.msra.mxu0 %v728_v21 }
  0xab   : > { %888 = vmatprep.subr.mxu0 %v727_v22 }
  0xac   : > { %889 = vmatpush3.msra.mxu0 %v727_v22 }
  0xad   : > { %890 = vmatprep.subr.mxu0 %v726_v24 }
  0xae   : > { %891 = vmatpush3.msra.mxu0 %v726_v24 }
  0xaf   : > { %892 = vmatprep.subr.mxu0 %v725_v27 }
  0xb0   : > { %893 = vmatpush3.msra.mxu0 %v725_v27 }
  0xb1   : > { %895 = vmatmul.mubr.msk.f32.vlgmr.msra.gmra.mxu0 %vm331_vm4, %v299_v28 }
 0x153   : > { %v830_v29 = vpop.f32.mrf.mxu0 }
 0x155   : > { %v404_v31 = vpop.f32.mrf.mxu0 }
 0x158   : > { %v863_v30 = vpop.f32.mrf.mxu1 }
 0x159   : > { %v488_v33 = vadd.f32 %v863_v30, %v830_v29 }
 0x15a   : > { %v482_v32 = vpop.f32.mrf.mxu1 }
 0x15b   : > { %v483_v36 = vadd.f32 %v482_v32, %v404_v31 }
 0x171   : > { %v896_v34 = vpop.f32.mrf.mxu0 }
 0x172   : > { %v586_v37 = vadd.f32 %v896_v34, %v488_v33 }
 0x173   : > { %v576_v39 = vpop.f32.mrf.mxu0 }
 0x174   : > { %v595_v40 = vmul.f32 %v742_v35, %v586_v37  ;;  %v585_v41 = vadd.f32 %v576_v39, %v483_v36 }
 0x176   : > { %v604_v42 = vadd.f32 %v743_v38, %v595_v40  ;;  %v594_v43 = vmul.f32 %v742_v35, %v585_v41 }
 0x178   : > { %v606_v44 = vmax.f32 %v604_v42, 0.0  ;;  %v603_v45 = vadd.f32 %v743_v38, %v594_v43 }
 0x17a   : > { %608 = vst [vmem:[%s219_s7 + $0x8] sm:$0xff] %v606_v44  ;;  %v605_v46 = vmax.f32 %v603_v45, 0.0 }
 0x17c   : > { %607 = vst [vmem:[%s219_s7] sm:$0xff] %v605_v46 }
 0x17d PF: > { %s14_s19 = sadd.s32 1, %s978_s19   ;;  %s1272_s15 = smov %s970_s17 }
 0x17e   : > { %p11_p7 = scmp.ge.s32.totalorder %s14_s19, 6   ;;  %s1273_s16 = smov %s974_s18 }
 0x17f   : > { %s1274_s17 = smov %s1277_s20  ;;  %s1275_s18 = smov %s1281_s21 }
 0x180   :  { %13 = sbr.rel (!%p11_p7) target bundleno = 3 (0x3), region = 69 }

// kernel: _lambda_.2
= control target key start
LH: loop header
LB: loop body
LE: loop exit
PB: predicated region body
PF: predicated region fallthrough
CT: control target
= control target key end

     0   :  { %s972_s12 = smov 0   ;;  %s974_s13 = smov 0   ;;  %s1235_s0 = inlined_call_operand.vmem [shape: f32[2,6,10,40], index: 0, kind: input, shape index: {}]   ;;  %s1236_s1 = inlined_call_operand.vmem [shape: f32[3,120,128], index: 1, kind: input, shape index: {}]   ;;  %s1237_s2 = inlined_call_operand.vmem [shape: f32[2,1,128], index: 2, kind: output, shape index: {0}]   ;;  %s1238_s3 = inlined_call_operand.vmem [shape: f32[2,1,128], index: 3, kind: output, shape index: {1}]  }
   0x1   :  { %s976_s14 = smov 0   ;;  %s978_s15 = smov 0  }
   0x2   :  { %s980_s16 = smov 0  }
   0x3 LB: > { %s23_s17 = sadd.s32 1, %s939_s14  ;;  %s26_s18 = sadd.s32 1, %s943_s15  ;;  %s947_s16 = sphi %s980_s16, %s14_s16   ;;  %s943_s15 = sphi %s978_s15, %s1242_s15   ;;  %s939_s14 = sphi %s976_s14, %s1241_s14   ;;  %s935_s13 = sphi %s974_s13, %s1240_s13   ;;  %s931_s12 = sphi %s972_s12, %s1239_s12  }
   0x4   : > { %p24_p0 = scmp.ge.s32.totalorder %s23_s17, 2  ;;  %p671_p1 = scmp.ge.s32.totalorder %s947_s16, 1 }
   0x5   : > { %p152_p2 = scmp.lt.s32.totalorder %s947_s16, 5 }
   0x6   : > { %s1244_s17 = smov (%p24_p0, %s23_s17), 0  ;;  %s1246_s18 = smov (!%p24_p0, %s26_s18), %s943_s15 }
   0x7   : > { %p153_p3 = pnand %p671_p1, %p152_p2  ;;  %p28_p4 = scmp.ge.s32.totalorder %s1246_s18, 2 }
   0x8   : > { %p177_p5 = scmp.lt.s32.totalorder (!%p153_p3), %s935_s13, 1  ;;  %p673_p6 = scmp.ne.s32.totalorder (!%p153_p3), %s931_s12, 0 }
   0x9   : > { %s1248_s18 = smov (%p28_p4, %s1246_s18), 0  ;;  %156 = sbr.rel (%p153_p3) target bundleno = 395 (0x18b), region = 28 }
   0xe   : > { %s1250_s13 = smov (!%p177_p5, %s935_s13), 1  ;;  %191 = sbr.rel (%p673_p6) target bundleno = 21 (0x15), region = 32 }
   0xf   : > { %s865_s19 = smul.u32 96, %s1250_s13  ;;  %s1007_s22 = scalar_lea.vmem %s1237_s2, %s1250_s13 }
  0x10   : > { %s1012_s25 = scalar_lea.vmem %s1238_s3, %s1250_s13 }
  0x11   : > { %s181_s28 = scalar_lea.vmem %s1235_s0, %s865_s19 }
  0x13   : > { %v949_v0 = vmov 0.0  }
  0x14   : > { %192 = vst [vmem:[%s1007_s22] sm:$0x1] %v949_v0  ;;  %193 = vst [vmem:[%s1012_s25] sm:$0x1] %v949_v0 }
  0x15 PF: > { %s714_s29 = sshll.u32 %s931_s12, 5  ;;  %v690_v1 = vld [vmem:[%s1236_s1 + $0xe8] sm:$0xff]  ;;  %v689_v2 = vld [vmem:[%s1236_s1 + $0xe0] sm:$0xff]  ;;  %vm207_vm0 = vcmask 1046528   ;;  %v688_v3 = vld [vmem:[%s1236_s1 + $0xd8] sm:$0xff]  ;;  %vm214_vm1 = vcmask 1045504  }
  0x16   : > { %s1027_s7 = scalar_lea.vmem %s181_s28, %s714_s29  ;;  %766 = vmatprep.subr.mxu0 %v690_v1  ;;  %v287_v4 = vld [vmem:[%s1236_s1 + $0x70] sm:$0xff]  ;;  %s950_s19 = smov 40   ;;  %v686_v22 = vld [vmem:[%s1236_s1 + $0xc8] sm:$0xff]  ;;  %v685_v32 = vld [vmem:[%s1236_s1 + $0xc0] sm:$0xff]  ;;  %vm221_vm2 = vcmask 326656   ;;  %vm223_vm3 = vcmask 654336  }
  0x17   : > { %v1036_v5 = vld [vmem:[%s1027_s7 + $0x20] sm:$0xff]  ;;  %v202_v6 = vld [vmem:[%s1027_s7 + $0x28] sm:$0x3]  ;;  %v1040_v7 = vld [vmem:[%s1027_s7 + $0x10] sm:$0xff]  ;;  %767 = vmatpush3.msra.mxu0 %v690_v1  ;;  %799 = vmatprep.subr.mxu1 %v287_v4  ;;  %s951_s30 = smov 80   ;;  %vm304_vm4 = vcmask 982016  }
  0x18   : > { %v243_v8 = vrot.slane %v1036_v5, 1  ;;  %v244_v9 = vrot.slane %v202_v6, 1  ;;  %v200_v10 = vld [vmem:[%s1027_s7 + $0x18] sm:$0x3]  ;;  %v227_v11 = vrot.slane %v1040_v7, 1  ;;  %v249_v12 = vrot.slane %v1036_v5, 2  ;;  %768 = vmatprep.subr.mxu0 %v689_v2  ;;  %800 = vmatpush3.msra.mxu1 %v287_v4 }
  0x19   : > { %v228_v13 = vrot.slane %v200_v10, 1  ;;  %v250_v14 = vrot.slane %v202_v6, 2  ;;  %v233_v15 = vrot.slane %v1040_v7, 2  ;;  %v234_v16 = vrot.slane %v200_v10, 2  ;;  %v1048_v17 = vld [vmem:[%s1027_s7] sm:$0xff]  ;;  %769 = vmatpush3.msra.mxu0 %v689_v2  ;;  %v687_v18 = vld [vmem:[%s1236_s1 + $0xd0] sm:$0xff] }
  0x1a   : > { %v245_v19 = vsel %vm207_vm0, %v243_v8, %v244_v9  ;;  %v198_v20 = vld [vmem:[%s1027_s7 + $0x8] sm:$0x3]  ;;  %770 = vmatprep.subr.mxu0 %v688_v3  ;;  %v215_v25 = vrot.slane %v1048_v17, 2  ;;  %v208_v28 = vrot.slane %v1048_v17, 1  ;;  %v1069_v30 = vld [vmem:[%s1027_s7 + $0x30] sm:$0xff]  ;;  %v285_v33 = vld [vmem:[%s1236_s1 + $0x60] sm:$0xff] }
  0x1b   : > { %246 = vrot.lane.b32.xlu1 %v245_v19, %s950_s19  ;;  %v229_v21 = vsel %vm207_vm0, %v227_v11, %v228_v13  ;;  %771 = vmatpush3.msra.mxu0 %v688_v3  ;;  %v286_v23 = vld [vmem:[%s1236_s1 + $0x68] sm:$0xff]  ;;  %v251_v24 = vsel %vm214_vm1, %v249_v12, %v250_v14  ;;  %v216_v26 = vrot.slane %v198_v20, 2  ;;  %v235_v27 = vsel %vm214_vm1, %v233_v15, %v234_v16  ;;  %v204_v31 = vld [vmem:[%s1027_s7 + $0x38] sm:$0x3]  ;;  %v683_v42 = vld [vmem:[%s1236_s1 + $0xb0] sm:$0xff] }
  0x1c   : > { %230 = vrot.lane.b32.xlu0 %v229_v21, %s950_s19  ;;  %772 = vmatprep.subr.mxu0 %v687_v18  ;;  %v209_v29 = vrot.slane %v198_v20, 1  ;;  %v684_v34 = vld [vmem:[%s1236_s1 + $0xb8] sm:$0xff]  ;;  %v265_v36 = vrot.slane %v1069_v30, 2  ;;  %v266_v37 = vrot.slane %v204_v31, 2  ;;  %v259_v40 = vrot.slane %v1069_v30, 1  ;;  %v283_v43 = vld [vmem:[%s1236_s1 + $0x50] sm:$0xff] }
  0x1d   : > { %773 = vmatpush3.msra.mxu0 %v687_v18  ;;  %801 = vmatprep.subr.mxu1 %v286_v23  ;;  %v217_v35 = vsel %vm214_vm1, %v215_v25, %v216_v26  ;;  %v284_v38 = vld [vmem:[%s1236_s1 + $0x58] sm:$0xff]  ;;  %v260_v41 = vrot.slane %v204_v31, 1  ;;  %v682_v46 = vld [vmem:[%s1236_s1 + $0xa8] sm:$0xff]  ;;  %v681_v48 = vld [vmem:[%s1236_s1 + $0xa0] sm:$0xff] }
  0x1e   : > { %774 = vmatprep.subr.mxu0 %v686_v22  ;;  %802 = vmatpush3.msra.mxu1 %v286_v23  ;;  %v210_v39 = vsel %vm207_vm0, %v208_v28, %v209_v29  ;;  %v267_v44 = vsel %vm214_vm1, %v265_v36, %v266_v37  ;;  %v282_v47 = vld [vmem:[%s1236_s1 + $0x48] sm:$0xff]  ;;  %v281_v49 = vld [vmem:[%s1236_s1 + $0x40] sm:$0xff]  ;;  %v680_v50 = vld [vmem:[%s1236_s1 + $0x98] sm:$0xff] }
  0x1f   : > { %252 = vrot.lane.b32.xlu1 %v251_v24, %s951_s30  ;;  %775 = vmatpush3.msra.mxu0 %v686_v22  ;;  %v261_v45 = vsel %vm207_vm0, %v259_v40, %v260_v41  ;;  %v280_v51 = vld [vmem:[%s1236_s1 + $0x38] sm:$0xff]  ;;  %v679_v52 = vld [vmem:[%s1236_s1 + $0x90] sm:$0xff]  ;;  %v678_v54 = vld [vmem:[%s1236_s1 + $0x88] sm:$0xff] }
  0x20   : > { %236 = vrot.lane.b32.xlu0 %v235_v27, %s951_s30  ;;  %776 = vmatprep.subr.mxu0 %v685_v32  ;;  %v279_v53 = vld [vmem:[%s1236_s1 + $0x30] sm:$0xff]  ;;  %v278_v55 = vld [vmem:[%s1236_s1 + $0x28] sm:$0xff]  ;;  %v677_v56 = vld [vmem:[%s1236_s1 + $0x80] sm:$0xff] }
  0x21   : > { %803 = vmatprep.subr.mxu1 %v285_v33  ;;  %777 = vmatpush3.msra.mxu0 %v685_v32  ;;  %v277_v57 = vld [vmem:[%s1236_s1 + $0x20] sm:$0xff]  ;;  %v676_v58 = vld [vmem:[%s1236_s1 + $0x78] sm:$0xff]  ;;  %v275_v61 = vld [vmem:[%s1236_s1 + $0x10] sm:$0xff] }
  0x22   : > { %804 = vmatpush3.msra.mxu1 %v285_v33  ;;  %778 = vmatprep.subr.mxu0 %v684_v34  ;;  %v276_v59 = vld [vmem:[%s1236_s1 + $0x18] sm:$0xff]  ;;  %v709_v60 = vld [vmem:[%s1236_s1 + $0x160] sm:$0xff]  ;;  %v274_v62 = vld [vmem:[%s1236_s1 + $0x8] sm:$0xff] }
  0x23   : > { %218 = vrot.lane.b32.xlu1 %v217_v35, %s951_s30  ;;  %805 = vmatprep.subr.mxu1 %v284_v38  ;;  %v273_v63 = vld [vmem:[%s1236_s1] sm:$0xff]  ;;  %v708_v10 = vld [vmem:[%s1236_s1 + $0x158] sm:$0xff]  ;;  %v706_v14 = vld [vmem:[%s1236_s1 + $0x148] sm:$0xff] }
  0x24   : > { %211 = vrot.lane.b32.xlu0 %v210_v39, %s950_s19  ;;  %779 = vmatpush3.msra.mxu0 %v684_v34  ;;  %v705_v15 = vld [vmem:[%s1236_s1 + $0x140] sm:$0xff]  ;;  %v704_v16 = vld [vmem:[%s1236_s1 + $0x138] sm:$0xff]  ;;  %v702_v18 = vld [vmem:[%s1236_s1 + $0x128] sm:$0xff] }
  0x25   : > { %806 = vmatpush3.msra.mxu1 %v284_v38  ;;  %780 = vmatprep.subr.mxu0 %v683_v42  ;;  %v701_v19 = vld [vmem:[%s1236_s1 + $0x120] sm:$0xff]  ;;  %v700_v20 = vld [vmem:[%s1236_s1 + $0x118] sm:$0xff]  ;;  %v699_v21 = vld [vmem:[%s1236_s1 + $0x110] sm:$0xff] }
  0x26   : > { %807 = vmatprep.subr.mxu1 %v283_v43  ;;  %781 = vmatpush3.msra.mxu0 %v683_v42  ;;  %v698_v22 = vld [vmem:[%s1236_s1 + $0x108] sm:$0xff]  ;;  %v697_v23 = vld [vmem:[%s1236_s1 + $0x100] sm:$0xff]  ;;  %v696_v25 = vld [vmem:[%s1236_s1 + $0xf8] sm:$0xff] }
  0x27   : > { %268 = vrot.lane.b32.xlu1 %v267_v44, %s951_s30  ;;  %808 = vmatpush3.msra.mxu1 %v283_v43  ;;  %v695_v28 = vld [vmem:[%s1236_s1 + $0xf0] sm:$0xff] }
  0x28   : > { %262 = vrot.lane.b32.xlu0 %v261_v45, %s950_s19  ;;  %782 = vmatprep.subr.mxu0 %v682_v46 }
  0x29   : > { %809 = vmatprep.subr.mxu1 %v282_v47  ;;  %783 = vmatpush3.msra.mxu0 %v682_v46 }
  0x2a   : > { %810 = vmatpush3.msra.mxu1 %v282_v47  ;;  %784 = vmatprep.subr.mxu0 %v681_v48 }
  0x2b   : > { %811 = vmatprep.subr.mxu1 %v281_v49  ;;  %785 = vmatpush3.msra.mxu0 %v681_v48 }
  0x2c   : > { %812 = vmatpush3.msra.mxu1 %v281_v49  ;;  %786 = vmatprep.subr.mxu0 %v680_v50 }
  0x2d   : > { %813 = vmatprep.subr.mxu1 %v280_v51  ;;  %787 = vmatpush3.msra.mxu0 %v680_v50 }
  0x2e   : > { %814 = vmatpush3.msra.mxu1 %v280_v51  ;;  %788 = vmatprep.subr.mxu0 %v679_v52 }
  0x2f   : > { %815 = vmatprep.subr.mxu1 %v279_v53  ;;  %789 = vmatpush3.msra.mxu0 %v679_v52 }
  0x30   : > { %816 = vmatpush3.msra.mxu1 %v279_v53  ;;  %790 = vmatprep.subr.mxu0 %v678_v54  ;;  %v560_v53 = vld [vmem:[%s1007_s22] sm:$0x1] }
  0x31   : > { %817 = vmatprep.subr.mxu1 %v278_v55  ;;  %791 = vmatpush3.msra.mxu0 %v678_v54 }
  0x32   : > { %818 = vmatpush3.msra.mxu1 %v278_v55  ;;  %792 = vmatprep.subr.mxu0 %v677_v56 }
  0x33   : > { %819 = vmatprep.subr.mxu1 %v277_v57  ;;  %793 = vmatpush3.msra.mxu0 %v677_v56  ;;  %v570_v56 = vld [vmem:[%s1012_s25] sm:$0x1] }
  0x34   : > { %820 = vmatpush3.msra.mxu1 %v277_v57  ;;  %794 = vmatprep.subr.mxu0 %v676_v58 }
  0x35   : > { %821 = vmatprep.subr.mxu1 %v276_v59  ;;  %795 = vmatpush3.msra.mxu0 %v676_v58 }
  0x36   : > { %822 = vmatpush3.msra.mxu1 %v276_v59  ;;  %832 = vmatprep.subr.mxu0 %v709_v60 }
  0x37   : > { %823 = vmatprep.subr.mxu1 %v275_v61 }
  0x38   : > { %824 = vmatpush3.msra.mxu1 %v275_v61 }
  0x39   : > { %825 = vmatprep.subr.mxu1 %v274_v62 }
  0x3a   : > { %826 = vmatpush3.msra.mxu1 %v274_v62 }
  0x3b   : > { %827 = vmatprep.subr.mxu1 %v273_v63 }
  0x3c   : > { %828 = vmatpush3.msra.mxu1 %v273_v63 }
  0x8d   : > { %v247_v0 = vpop.permute.xlu1 %246 }
  0x8e   : > { %v231_v1 = vpop.permute.xlu0 %230  ;;  %v255_v2 = vsel %vm221_vm2, %v1036_v5, %v247_v0 }
  0x8f   : > { %v239_v4 = vsel %vm221_vm2, %v1040_v7, %v231_v1  ;;  %v707_v7 = vld [vmem:[%s1236_s1 + $0x150] sm:$0xff] }
  0x91   : > { %v253_v3 = vpop.permute.xlu1 %252 }
  0x92   : > { %v256_v6 = vsel %vm223_vm3, %v255_v2, %v253_v3  ;;  %v237_v8 = vpop.permute.xlu0 %236 }
  0x93   : > { %v240_v9 = vsel %vm223_vm3, %v239_v4, %v237_v8 }
  0x94   : > { %796 = vmatprep.mubr.msk.f32.mxu0 %vm304_vm4, %v240_v9 }
  0x95   : > { %797 = vmatmul.mubr.msk.f32.vlgmr.msra.gmra.mxu0 %vm304_vm4, %v256_v6  ;;  %v219_v11 = vpop.permute.xlu1 %218 }
  0x96   : > { %833 = vmatpush3.msra.mxu0 %v709_v60  ;;  %862 = vmatprep.mubr.msk.f32.mxu0 %vm304_vm4, %v256_v6  ;;  %v212_v5 = vpop.permute.xlu0 %211 }
  0x97   : > { %834 = vmatprep.subr.mxu0 %v708_v10  ;;  %v222_v12 = vsel %vm221_vm2, %v1048_v17, %v212_v5  ;;  %v703_v17 = vld [vmem:[%s1236_s1 + $0x130] sm:$0xff] }
  0x98   : > { %835 = vmatpush3.msra.mxu0 %v708_v10  ;;  %v224_v13 = vsel %vm223_vm3, %v222_v12, %v219_v11 }
  0x99   : > { %836 = vmatprep.subr.mxu0 %v707_v7  ;;  %829 = vmatprep.mubr.msk.f32.mxu1 %vm304_vm4, %v224_v13  ;;  %v269_v27 = vpop.permute.xlu1 %268 }
  0x9a   : > { %837 = vmatpush3.msra.mxu0 %v707_v7  ;;  %830 = vmatmul.mubr.msk.f32.vlgmr.msra.gmra.mxu1 %vm304_vm4, %v240_v9  ;;  %v263_v24 = vpop.permute.xlu0 %262 }
  0x9b   : > { %838 = vmatprep.subr.mxu0 %v706_v14  ;;  %v271_v26 = vsel %vm221_vm2, %v1069_v30, %v263_v24 }
  0x9c   : > { %839 = vmatpush3.msra.mxu0 %v706_v14  ;;  %v272_v29 = vsel %vm223_vm3, %v271_v26, %v269_v27 }
  0x9d   : > { %840 = vmatprep.subr.mxu0 %v705_v15 }
  0x9e   : > { %841 = vmatpush3.msra.mxu0 %v705_v15 }
  0x9f   : > { %842 = vmatprep.subr.mxu0 %v704_v16 }
  0xa0   : > { %843 = vmatpush3.msra.mxu0 %v704_v16 }
  0xa1   : > { %844 = vmatprep.subr.mxu0 %v703_v17 }
  0xa2   : > { %845 = vmatpush3.msra.mxu0 %v703_v17 }
  0xa3   : > { %846 = vmatprep.subr.mxu0 %v702_v18 }
  0xa4   : > { %847 = vmatpush3.msra.mxu0 %v702_v18 }
  0xa5   : > { %848 = vmatprep.subr.mxu0 %v701_v19 }
  0xa6   : > { %849 = vmatpush3.msra.mxu0 %v701_v19 }
  0xa7   : > { %850 = vmatprep.subr.mxu0 %v700_v20 }
  0xa8   : > { %851 = vmatpush3.msra.mxu0 %v700_v20 }
  0xa9   : > { %852 = vmatprep.subr.mxu0 %v699_v21 }
  0xaa   : > { %853 = vmatpush3.msra.mxu0 %v699_v21 }
  0xab   : > { %854 = vmatprep.subr.mxu0 %v698_v22 }
  0xac   : > { %855 = vmatpush3.msra.mxu0 %v698_v22 }
  0xad   : > { %856 = vmatprep.subr.mxu0 %v697_v23 }
  0xae   : > { %857 = vmatpush3.msra.mxu0 %v697_v23 }
  0xaf   : > { %858 = vmatprep.subr.mxu0 %v696_v25 }
  0xb0   : > { %859 = vmatpush3.msra.mxu0 %v696_v25 }
  0xb1   : > { %860 = vmatprep.subr.mxu0 %v695_v28 }
  0xb2   : > { %861 = vmatpush3.msra.mxu0 %v695_v28 }
  0xb3   : > { %863 = vmatmul.mubr.msk.f32.vlgmr.msra.gmra.mxu0 %vm304_vm4, %v272_v29 }
 0x155   : > { %v798_v31 = vpop.f32.mrf.mxu0 }
 0x157   : > { %v377_v33 = vpop.f32.mrf.mxu0 }
 0x15a   : > { %v831_v32 = vpop.f32.mrf.mxu1 }
 0x15b   : > { %v461_v35 = vadd.f32 %v831_v32, %v798_v31 }
 0x15c   : > { %v455_v34 = vpop.f32.mrf.mxu1 }
 0x15d   : > { %v456_v36 = vadd.f32 %v455_v34, %v377_v33 }
 0x173   : > { %v864_v30 = vpop.f32.mrf.mxu0 }
 0x174   : > { %v559_v37 = vadd.f32 %v864_v30, %v461_v35 }
 0x175   : > { %v549_v38 = vpop.f32.mrf.mxu0 }
 0x176   : > { %v558_v39 = vadd.f32 %v549_v38, %v456_v36  ;;  %v572_v40 = vmul.f32 %v559_v37, %v559_v37 }
 0x178   : > { %v561_v41 = vadd.f32 %v559_v37, %v558_v39  ;;  %v571_v42 = vmul.f32 %v558_v39, %v558_v39 }
 0x17a   : > { %v562_v43 = vrot.slane %v561_v41, 4  ;;  %v573_v44 = vadd.f32 %v572_v40, %v571_v42 }
 0x17c   : > { %v563_v45 = vadd.f32 %v562_v43, %v561_v41  ;;  %v574_v46 = vrot.slane %v573_v44, 4 }
 0x17e   : > { %v564_v47 = vrot.slane %v563_v45, 2  ;;  %v575_v48 = vadd.f32 %v574_v46, %v573_v44 }
 0x180   : > { %v565_v49 = vadd.f32 %v564_v47, %v563_v45  ;;  %v576_v50 = vrot.slane %v575_v48, 2 }
 0x182   : > { %v566_v51 = vrot.slane %v565_v49, 1  ;;  %v577_v52 = vadd.f32 %v576_v50, %v575_v48 }
 0x184   : > { %v567_v54 = vadd.f32 %v566_v51, %v565_v49  ;;  %v578_v55 = vrot.slane %v577_v52, 1 }
 0x186   : > { %v568_v57 = vadd.f32 %v567_v54, %v560_v53  ;;  %v579_v58 = vadd.f32 %v578_v55, %v577_v52 }
 0x188   : > { %569 = vst [vmem:[%s1007_s22] sm:$0x1] %v568_v57  ;;  %v580_v59 = vadd.f32 %v579_v58, %v570_v56 }
 0x18a   : > { %581 = vst [vmem:[%s1012_s25] sm:$0x1] %v580_v59 }
 0x18b PF: > { %s14_s16 = sadd.s32 1, %s947_s16   ;;  %s1239_s12 = smov %s939_s14 }
 0x18c   : > { %p11_p7 = scmp.ge.s32.totalorder %s14_s16, 6   ;;  %s1240_s13 = smov %s943_s15 }
 0x18d   : > { %s1241_s14 = smov %s1244_s17  ;;  %s1242_s15 = smov %s1248_s18 }
 0x18e   :  { %13 = sbr.rel (!%p11_p7) target bundleno = 3 (0x3), region = 77 }

</bundles_post_ra>
